<compile_context>
chip_gen: v6e
topology: v6e:2x2x1
jax: 0.10.0
libtpu: 0.0.40
codegen_flags: <defaults>
</compile_context>

<pallas_src>
import functools

import jax
import jax.numpy as jnp
from jax.experimental import pallas as pl
from jax.experimental.pallas import tpu as pltpu

_EPS = 1e-12  # F.normalize default eps


def _round_up(n, m):
    return (n + m - 1) // m * m


def _cos_kernel(x_ref, w_ref, rx_ref, rw_ref, o_ref, *, use_bf16):
    # x_ref: (TM, Dp), w_ref: (Dp, TN), rx_ref: (TM, 1), rw_ref: (1, TN)
    x = x_ref[...]
    w = w_ref[...]
    if use_bf16:
        x = x.astype(jnp.bfloat16)
        w = w.astype(jnp.bfloat16)
    # MXU matmul with f32 accumulation; normalization folded into the epilogue.
    acc = jnp.dot(x, w, preferred_element_type=jnp.float32)      # (TM, TN)
    cos = acc * rx_ref[...] * rw_ref[...]                         # scale rows/cols
    o_ref[...] = jnp.clip(cos, -1.0, 1.0).astype(o_ref.dtype)


def angle_simple_linear(x, weight, *, tm=None, tn=None, use_bf16=False):
    """x: (B, in_features) f32, weight: (in_features, out_features) f32."""
    B, D = x.shape
    D2, C = weight.shape
    assert D == D2

    # ---- lane-dense padding & tile selection -------------------------------
    Dp = _round_up(D, 128)
    TM = tm if tm is not None else min(256, _round_up(B, 8))
    TN = tn if tn is not None else min(256, _round_up(C, 128))
    Bp = _round_up(B, TM)
    Cp = _round_up(C, TN)

    xp = x.astype(jnp.float32)
    if (Bp, Dp) != (B, D):
        xp = jnp.pad(xp, ((0, Bp - B), (0, Dp - D)))
    wp = weight.astype(jnp.float32)
    if (Dp, Cp) != (D, C):
        wp = jnp.pad(wp, ((0, Dp - D), (0, Cp - C)))

    # ---- hoisted one-time inverse norms (exact F.normalize semantics) ------
    # 1 / max(||v||, eps) == rsqrt(max(sum(v^2), eps^2))
    inv_x = jax.lax.rsqrt(
        jnp.maximum(jnp.sum(xp * xp, axis=1, keepdims=True), _EPS * _EPS))  # (Bp, 1)
    inv_w = jax.lax.rsqrt(
        jnp.maximum(jnp.sum(wp * wp, axis=0, keepdims=True), _EPS * _EPS))  # (1, Cp)

    # ---- VMEM budget (sized so v7x's 64 MiB per TC is respected) -----------
    est = 4 * (2 * (TM * Dp + Dp * TN + TM * TN) + TM + TN) + (2 << 20)
    vmem_limit = int(min(max(est, 8 << 20), 64 << 20))

    grid = (Bp // TM, Cp // TN)
    kernel = functools.partial(_cos_kernel, use_bf16=use_bf16)

    out = pl.pallas_call(
        kernel,
        out_shape=jax.ShapeDtypeStruct((Bp, Cp), jnp.float32),
        grid=grid,
        in_specs=[
            pl.BlockSpec((TM, Dp), lambda i, j: (i, 0),
                         memory_space=pltpu.MemorySpace.VMEM),
            pl.BlockSpec((Dp, TN), lambda i, j: (0, j),
                         memory_space=pltpu.MemorySpace.VMEM),
            pl.BlockSpec((TM, 1), lambda i, j: (i, 0),
                         memory_space=pltpu.MemorySpace.VMEM),
            pl.BlockSpec((1, TN), lambda i, j: (0, j),
                         memory_space=pltpu.MemorySpace.VMEM),
        ],
        out_specs=pl.BlockSpec((TM, TN), lambda i, j: (i, j),
                               memory_space=pltpu.MemorySpace.VMEM),
        compiler_params=pltpu.CompilerParams(
            dimension_semantics=("parallel", "parallel"),
            vmem_limit_bytes=vmem_limit,
        ),
    )(xp, wp, inv_x, inv_w)

    return out[:B, :C]


def init_weight(key, in_features, out_features):
    """Replicates: Tensor(in,out).uniform_(-1,1).renorm_(2, 1, 1e-5).mul_(1e5)."""
    w = jax.random.uniform(key, (in_features, out_features),
                           dtype=jnp.float32, minval=-1.0, maxval=1.0)
    maxnorm = 1e-5
    col_norm = jnp.sqrt(jnp.sum(w * w, axis=0, keepdims=True))      # (1, out)
    # torch.renorm scales slices whose norm exceeds maxnorm by maxnorm/(norm+1e-7)
    scale = jnp.where(col_norm > maxnorm, maxnorm / (col_norm + 1e-7), 1.0)
    w = w * scale
    return w * 1e5


def reference(x, weight):
    xn = x / jnp.maximum(
        jnp.sqrt(jnp.sum(x * x, axis=1, keepdims=True)), _EPS)
    wn = weight / jnp.maximum(
        jnp.sqrt(jnp.sum(weight * weight, axis=0, keepdims=True)), _EPS)
    return jnp.clip(xn @ wn, -1.0, 1.0)


if __name__ == "__main__":
    key = jax.random.PRNGKey(0)
    k_w, k_x = jax.random.split(key)

    # Shapes consistent with Two_Stream_Net: anglelinear = AngleSimpleLinear(2048, 2)
    in_features, out_features, batch = 2048, 2, 8
    weight = init_weight(k_w, in_features, out_features)
    x = jax.random.normal(k_x, (batch, in_features), dtype=jnp.float32)

    out = angle_simple_linear(x, weight)
    out = jax.block_until_ready(out)

    ref = reference(x, weight)
    assert out.shape == (batch, out_features)
    assert jnp.allclose(out, ref, atol=1e-5, rtol=1e-5), "mismatch vs reference"
    assert bool(jnp.all(out <= 1.0)) and bool(jnp.all(out >= -1.0))

    print("KERNEL_OK")
</pallas_src>

<mosaic_0001>
module attributes {stable_mosaic.version = 11 : i64} {
  func.func @_cos_kernel(%arg0: i32, %arg1: i32, %arg2: memref<8x2048xf32, #tpu.memory_space<vmem>>, %arg3: memref<2048x128xf32, #tpu.memory_space<vmem>>, %arg4: memref<8x1xf32, #tpu.memory_space<vmem>>, %arg5: memref<1x128xf32, #tpu.memory_space<vmem>>, %arg6: memref<8x128xf32, #tpu.memory_space<vmem>>) attributes {dimension_semantics = [#tpu.dimension_semantics<parallel>, #tpu.dimension_semantics<parallel>], iteration_bounds = array<i64: 1, 1>, scalar_prefetch = 0 : i64, scratch_operands = 0 : i64, tpu.core_type = #tpu.core_type<tc>, window_params = [{transform_indices = @transform_0, window_bounds = array<i64: 8, 2048>}, {transform_indices = @transform_1, window_bounds = array<i64: 2048, 128>}, {transform_indices = @transform_2, window_bounds = array<i64: 8, 1>}, {transform_indices = @transform_3, window_bounds = array<i64: 1, 128>}, {transform_indices = @transform_4, window_bounds = array<i64: 8, 128>}]} {
    %c0 = arith.constant 0 : index
    %c0_0 = arith.constant 0 : index
    %0 = vector.load %arg2[%c0, %c0_0] : memref<8x2048xf32, #tpu.memory_space<vmem>>, vector<8x2048xf32>
    %c0_1 = arith.constant 0 : index
    %c0_2 = arith.constant 0 : index
    %1 = vector.load %arg3[%c0_1, %c0_2] : memref<2048x128xf32, #tpu.memory_space<vmem>>, vector<2048x128xf32>
    %cst = arith.constant dense<0.000000e+00> : vector<8x128xf32>
    %2 = tpu.matmul %0, %1, %cst {dimension_numbers = #tpu.dot_dimension_numbers<[1], [0], [0], [1], [0, 0, 1, 1], [], []>} : vector<8x2048xf32>, vector<2048x128xf32>, vector<8x128xf32> -> vector<8x128xf32>
    %c0_3 = arith.constant 0 : index
    %c0_4 = arith.constant 0 : index
    %3 = vector.load %arg4[%c0_3, %c0_4] : memref<8x1xf32, #tpu.memory_space<vmem>>, vector<8x1xf32>
    %4 = vector.broadcast %3 : vector<8x1xf32> to vector<8x128xf32>
    %5 = arith.mulf %2, %4 : vector<8x128xf32>
    %c0_5 = arith.constant 0 : index
    %c0_6 = arith.constant 0 : index
    %6 = vector.load %arg5[%c0_5, %c0_6] : memref<1x128xf32, #tpu.memory_space<vmem>>, vector<1x128xf32>
    %7 = vector.broadcast %6 : vector<1x128xf32> to vector<8x128xf32>
    %8 = arith.mulf %5, %7 : vector<8x128xf32>
    %cst_7 = arith.constant -1.000000e+00 : f32
    %cst_8 = arith.constant 1.000000e+00 : f32
    %9 = vector.broadcast %cst_7 : f32 to vector<8x128xf32>
    %10 = arith.maximumf %9, %8 : vector<8x128xf32>
    %11 = vector.broadcast %cst_8 : f32 to vector<8x128xf32>
    %12 = arith.minimumf %11, %10 : vector<8x128xf32>
    %c0_9 = arith.constant 0 : index
    %c0_10 = arith.constant 0 : index
    %13 = vector.load %arg6[%c0_9, %c0_10] : memref<8x128xf32, #tpu.memory_space<vmem>>, vector<8x128xf32>
    tpu.vector_store %arg6[%c0_9, %c0_10], %12 {strides = array<i32>} : memref<8x128xf32, #tpu.memory_space<vmem>>, vector<8x128xf32>,
    return
  }
  func.func @transform_0(%arg0: i32, %arg1: i32) -> (i32, i32) {
    %c0_i32 = arith.constant 0 : i32
    %c0_i32_0 = arith.constant 0 : i32
    return %arg0, %c0_i32 : i32, i32
  }
  func.func @transform_1(%arg0: i32, %arg1: i32) -> (i32, i32) {
    %c0_i32 = arith.constant 0 : i32
    %c0_i32_0 = arith.constant 0 : i32
    return %c0_i32, %arg1 : i32, i32
  }
  func.func @transform_2(%arg0: i32, %arg1: i32) -> (i32, i32) {
    %c0_i32 = arith.constant 0 : i32
    %c0_i32_0 = arith.constant 0 : i32
    return %arg0, %c0_i32 : i32, i32
  }
  func.func @transform_3(%arg0: i32, %arg1: i32) -> (i32, i32) {
    %c0_i32 = arith.constant 0 : i32
    %c0_i32_0 = arith.constant 0 : i32
    return %c0_i32, %arg1 : i32, i32
  }
  func.func @transform_4(%arg0: i32, %arg1: i32) -> (i32, i32) {
    %c0_i32 = arith.constant 0 : i32
    return %arg0, %arg1 : i32, i32
  }
}

</mosaic_0001>

<bundles_post_ra>
// kernel: tpu_custom_call.1
= control target key start
LH: loop header
LB: loop body
LE: loop exit
PB: predicated region body
PF: predicated region fallthrough
CT: control target
= control target key end

     0   :  { %9 = vsyncpa [#allocation3], 0  ;;  %s1311_s0 = inlined_call_operand.hbm [shape: f32[8,2048], index: 0, kind: input, shape index: {}]   ;;  %s1312_s1 = inlined_call_operand.hbm [shape: f32[2048,128], index: 1, kind: input, shape index: {}]   ;;  %s1313_s2 = inlined_call_operand.vmem [shape: f32[8,1], index: 2, kind: input, shape index: {}]   ;;  %s1314_s3 = inlined_call_operand.vmem [shape: f32[1,128], index: 3, kind: input, shape index: {}]   ;;  %s1315_s4 = inlined_call_operand.hbm [shape: f32[8,128], index: 4, kind: output, shape index: {}]  }
   0x1   :  { %10 = vsyncpa [#allocation6], 0 }
   0x2   :  { %11 = vsyncpa [#allocation4], 0  ;;  %s1265_s15 = smov [#allocation2]   ;;  %s1266_s17 = smov [#allocation5]  }
   0x3   :  { %s18_s16 = sshll.u32 %s1265_s15, 4  ;;  %s27_s18 = sshll.u32 %s1266_s17, 4  ;;  %s19_s16 = int_to_ptr.vmem [resolvable:$true] %s18_s16  ;;  %s28_s18 = int_to_ptr.vmem [resolvable:$true] %s27_s18 }
   0x4   :  { %s1207_s19 = scalar_lea.vmem %s19_s16, 2048  ;;  %p1212_p1 = scmp.lt.s32.totalorder %s19_s16, %s19_s16 }
   0x5   :  { %p1208_p0 = scmp.ne.s32.totalorder %s19_s16, %s1207_s19  ;;  %p1213_p2 = scmp.lt.s32.totalorder %s1207_s19, %s1207_s19 }
   0x7   :  { %p1214_p3 = por %p1213_p2, %p1212_p1 }
   0x9   :  { %p1215_p4 = pnand %p1214_p3, %p1208_p0 }
   0xb   :  { %1218 = shalt.err (!%p1215_p4)
}
   0xc   :  { %21 = dma.hbm_to_vmem [thread:$0]  %s1311_s0, 2048, %s19_s16, [#allocation3]  }
   0xd   :  { %s1227_s22 = scalar_lea.vmem %s28_s18, 32768  ;;  %p1232_p6 = scmp.lt.s32.totalorder %s28_s18, %s28_s18 }
   0xe   :  { %p1228_p5 = scmp.ne.s32.totalorder %s28_s18, %s1227_s22  ;;  %p1233_p7 = scmp.lt.s32.totalorder %s1227_s22, %s1227_s22 }
  0x10   :  { %p1234_p8 = por %p1233_p7, %p1232_p6 }
  0x12   :  { %p1235_p9 = pnand %p1234_p8, %p1228_p5 }
  0x14   :  { %1238 = shalt.err (!%p1235_p9)
}
  0x15   :  { %s1267_s23 = smov 128   ;;  %s1268_s24 = smov 8  }
  0x16   :  { %33 = dma.hbm_to_vmem [thread:$0]  %s1312_s1, 32768, %s28_s18, [#allocation6], %s1267_s23, %s1267_s23, %s1268_s24  }
  0x17   :  { %1259 = dma.done.wait [#allocation3], 2048  }
  0x18   :  { %1260 = vsyncadd [#allocation3], 4294965248 }
  0x19   :  { %1261 = dma.done.wait [#allocation6], 32768  }
  0x1a   :  { %1262 = vsyncadd [#allocation6], 4294934528  ;;  %v91_v0 = vld [vmem:[#allocation5 + $0xf8] sm:$0xff]  ;;  %v90_v4 = vld [vmem:[#allocation5 + $0xf0] sm:$0xff]  ;;  %s1270_s28 = smov [#allocation7]  }
  0x1b   :  { %v123_v1 = vld [vmem:[#allocation5 + $0x1f8] sm:$0xff]  ;;  %912 = vmatprep.subr.mxu0 %v91_v0  ;;  %v122_v5 = vld [vmem:[#allocation5 + $0x1f0] sm:$0xff]  ;;  %v89_v8 = vld [vmem:[#allocation5 + $0xe8] sm:$0xff]  ;;  %s900_s29 = sshll.u32 %s1270_s28, 4  ;;  %s901_s29 = int_to_ptr.vmem [resolvable:$true] %s900_s29 }
  0x1c   :  { %v75_v2 = vld [vmem:[#allocation5 + $0x78] sm:$0xff]  ;;  %947 = vmatprep.subr.mxu1 %v123_v1  ;;  %v74_v6 = vld [vmem:[#allocation5 + $0x70] sm:$0xff]  ;;  %v121_v9 = vld [vmem:[#allocation5 + $0x1e8] sm:$0xff]  ;;  %s1239_s30 = scalar_lea.vmem %s901_s29, 128  ;;  %p1244_p11 = scmp.lt.s32.totalorder %s901_s29, %s901_s29 }
  0x1d   :  { %v107_v3 = vld [vmem:[#allocation5 + $0x178] sm:$0xff]  ;;  %913 = vmatpush3.msra.mxu0 %v75_v2  ;;  %v106_v7 = vld [vmem:[#allocation5 + $0x170] sm:$0xff]  ;;  %v73_v10 = vld [vmem:[#allocation5 + $0x68] sm:$0xff]  ;;  %p1240_p10 = scmp.ne.s32.totalorder %s901_s29, %s1239_s30  ;;  %p1245_p12 = scmp.lt.s32.totalorder %s1239_s30, %s1239_s30 }
  0x1e   :  { %948 = vmatpush3.msra.mxu1 %v107_v3  ;;  %914 = vmatprep.subr.mxu0 %v90_v4  ;;  %v105_v11 = vld [vmem:[#allocation5 + $0x168] sm:$0xff]  ;;  %v88_v12 = vld [vmem:[#allocation5 + $0xe0] sm:$0xff]  ;;  %v87_v16 = vld [vmem:[#allocation5 + $0xd8] sm:$0xff] }
  0x1f   :  { %949 = vmatprep.subr.mxu1 %v122_v5  ;;  %915 = vmatpush3.msra.mxu0 %v74_v6  ;;  %v120_v13 = vld [vmem:[#allocation5 + $0x1e0] sm:$0xff]  ;;  %v119_v17 = vld [vmem:[#allocation5 + $0x1d8] sm:$0xff]  ;;  %v86_v20 = vld [vmem:[#allocation5 + $0xd0] sm:$0xff]  ;;  %p1246_p13 = por %p1245_p12, %p1244_p11 }
  0x20   :  { %950 = vmatpush3.msra.mxu1 %v106_v7  ;;  %916 = vmatprep.subr.mxu0 %v89_v8  ;;  %v72_v14 = vld [vmem:[#allocation5 + $0x60] sm:$0xff]  ;;  %v71_v18 = vld [vmem:[#allocation5 + $0x58] sm:$0xff]  ;;  %v118_v21 = vld [vmem:[#allocation5 + $0x1d0] sm:$0xff] }
  0x21   :  { %951 = vmatprep.subr.mxu1 %v121_v9  ;;  %v104_v15 = vld [vmem:[#allocation5 + $0x160] sm:$0xff]  ;;  %917 = vmatpush3.msra.mxu0 %v73_v10  ;;  %v103_v19 = vld [vmem:[#allocation5 + $0x158] sm:$0xff]  ;;  %v70_v22 = vld [vmem:[#allocation5 + $0x50] sm:$0xff]  ;;  %p1247_p0 = pnand %p1246_p13, %p1240_p10 }
  0x22   :  { %952 = vmatpush3.msra.mxu1 %v105_v11  ;;  %918 = vmatprep.subr.mxu0 %v88_v12  ;;  %v102_v23 = vld [vmem:[#allocation5 + $0x150] sm:$0xff]  ;;  %v85_v24 = vld [vmem:[#allocation5 + $0xc8] sm:$0xff]  ;;  %v84_v28 = vld [vmem:[#allocation5 + $0xc0] sm:$0xff] }
  0x23   :  { %953 = vmatprep.subr.mxu1 %v120_v13  ;;  %919 = vmatpush3.msra.mxu0 %v72_v14  ;;  %v117_v25 = vld [vmem:[#allocation5 + $0x1c8] sm:$0xff]  ;;  %v116_v29 = vld [vmem:[#allocation5 + $0x1c0] sm:$0xff]  ;;  %v83_v32 = vld [vmem:[#allocation5 + $0xb8] sm:$0xff] }
  0x24   :  { %954 = vmatpush3.msra.mxu1 %v104_v15  ;;  %920 = vmatprep.subr.mxu0 %v87_v16  ;;  %v69_v26 = vld [vmem:[#allocation5 + $0x48] sm:$0xff]  ;;  %v68_v30 = vld [vmem:[#allocation5 + $0x40] sm:$0xff]  ;;  %v115_v33 = vld [vmem:[#allocation5 + $0x1b8] sm:$0xff] }
  0x25   :  { %955 = vmatprep.subr.mxu1 %v119_v17  ;;  %921 = vmatpush3.msra.mxu0 %v71_v18  ;;  %v101_v27 = vld [vmem:[#allocation5 + $0x148] sm:$0xff]  ;;  %v100_v31 = vld [vmem:[#allocation5 + $0x140] sm:$0xff]  ;;  %v67_v34 = vld [vmem:[#allocation5 + $0x38] sm:$0xff] }
  0x26   :  { %956 = vmatpush3.msra.mxu1 %v103_v19  ;;  %922 = vmatprep.subr.mxu0 %v86_v20  ;;  %v99_v35 = vld [vmem:[#allocation5 + $0x138] sm:$0xff]  ;;  %v82_v36 = vld [vmem:[#allocation5 + $0xb0] sm:$0xff]  ;;  %v81_v40 = vld [vmem:[#allocation5 + $0xa8] sm:$0xff] }
  0x27   :  { %957 = vmatprep.subr.mxu1 %v118_v21  ;;  %923 = vmatpush3.msra.mxu0 %v70_v22  ;;  %v114_v37 = vld [vmem:[#allocation5 + $0x1b0] sm:$0xff]  ;;  %v113_v41 = vld [vmem:[#allocation5 + $0x1a8] sm:$0xff]  ;;  %v80_v44 = vld [vmem:[#allocation5 + $0xa0] sm:$0xff] }
  0x28   :  { %958 = vmatpush3.msra.mxu1 %v102_v23  ;;  %924 = vmatprep.subr.mxu0 %v85_v24  ;;  %v66_v38 = vld [vmem:[#allocation5 + $0x30] sm:$0xff]  ;;  %v65_v42 = vld [vmem:[#allocation5 + $0x28] sm:$0xff]  ;;  %v112_v45 = vld [vmem:[#allocation5 + $0x1a0] sm:$0xff] }
  0x29   :  { %959 = vmatprep.subr.mxu1 %v117_v25  ;;  %925 = vmatpush3.msra.mxu0 %v69_v26  ;;  %v98_v39 = vld [vmem:[#allocation5 + $0x130] sm:$0xff]  ;;  %v97_v43 = vld [vmem:[#allocation5 + $0x128] sm:$0xff]  ;;  %v64_v46 = vld [vmem:[#allocation5 + $0x20] sm:$0xff] }
  0x2a   :  { %960 = vmatpush3.msra.mxu1 %v101_v27  ;;  %926 = vmatprep.subr.mxu0 %v84_v28  ;;  %v96_v47 = vld [vmem:[#allocation5 + $0x120] sm:$0xff]  ;;  %v79_v48 = vld [vmem:[#allocation5 + $0x98] sm:$0xff]  ;;  %v78_v52 = vld [vmem:[#allocation5 + $0x90] sm:$0xff] }
  0x2b   :  { %961 = vmatprep.subr.mxu1 %v116_v29  ;;  %927 = vmatpush3.msra.mxu0 %v68_v30  ;;  %v111_v49 = vld [vmem:[#allocation5 + $0x198] sm:$0xff]  ;;  %v110_v53 = vld [vmem:[#allocation5 + $0x190] sm:$0xff]  ;;  %v77_v56 = vld [vmem:[#allocation5 + $0x88] sm:$0xff] }
  0x2c   :  { %962 = vmatpush3.msra.mxu1 %v100_v31  ;;  %928 = vmatprep.subr.mxu0 %v83_v32  ;;  %v63_v50 = vld [vmem:[#allocation5 + $0x18] sm:$0xff]  ;;  %v62_v54 = vld [vmem:[#allocation5 + $0x10] sm:$0xff]  ;;  %v109_v57 = vld [vmem:[#allocation5 + $0x188] sm:$0xff] }
  0x2d   :  { %963 = vmatprep.subr.mxu1 %v115_v33  ;;  %929 = vmatpush3.msra.mxu0 %v67_v34  ;;  %v95_v51 = vld [vmem:[#allocation5 + $0x118] sm:$0xff]  ;;  %v94_v55 = vld [vmem:[#allocation5 + $0x110] sm:$0xff]  ;;  %v61_v58 = vld [vmem:[#allocation5 + $0x8] sm:$0xff] }
  0x2e   :  { %964 = vmatpush3.msra.mxu1 %v99_v35  ;;  %930 = vmatprep.subr.mxu0 %v82_v36  ;;  %v93_v59 = vld [vmem:[#allocation5 + $0x108] sm:$0xff]  ;;  %v76_v60 = vld [vmem:[#allocation5 + $0x80] sm:$0xff]  ;;  %v47_v1 = vld [vmem:[#allocation2 + $0x18] sm:$0xff] }
  0x2f   :  { %965 = vmatprep.subr.mxu1 %v114_v37  ;;  %931 = vmatpush3.msra.mxu0 %v66_v38  ;;  %v108_v61 = vld [vmem:[#allocation5 + $0x180] sm:$0xff]  ;;  %v45_v63 = vld [vmem:[#allocation2 + $0x8] sm:$0xff]  ;;  %v46_v3 = vld [vmem:[#allocation2 + $0x10] sm:$0xff] }
  0x30   :  { %966 = vmatpush3.msra.mxu1 %v98_v39  ;;  %932 = vmatprep.subr.mxu0 %v81_v40  ;;  %v60_v62 = vld [vmem:[#allocation5] sm:$0xff]  ;;  %v155_v4 = vld [vmem:[#allocation5 + $0x2f8] sm:$0xff]  ;;  %v154_v8 = vld [vmem:[#allocation5 + $0x2f0] sm:$0xff] }
  0x31   :  { %967 = vmatprep.subr.mxu1 %v113_v41  ;;  %933 = vmatpush3.msra.mxu0 %v65_v42  ;;  %v92_v0 = vld [vmem:[#allocation5 + $0x100] sm:$0xff]  ;;  %v187_v5 = vld [vmem:[#allocation5 + $0x3f8] sm:$0xff]  ;;  %v186_v9 = vld [vmem:[#allocation5 + $0x3f0] sm:$0xff] }
  0x32   :  { %968 = vmatpush3.msra.mxu1 %v97_v43  ;;  %934 = vmatprep.subr.mxu0 %v80_v44  ;;  %v44_v2 = vld [vmem:[#allocation2] sm:$0xff]  ;;  %v139_v6 = vld [vmem:[#allocation5 + $0x278] sm:$0xff]  ;;  %v138_v10 = vld [vmem:[#allocation5 + $0x270] sm:$0xff] }
  0x33   :  { %969 = vmatprep.subr.mxu1 %v112_v45  ;;  %935 = vmatpush3.msra.mxu0 %v64_v46  ;;  %v171_v7 = vld [vmem:[#allocation5 + $0x378] sm:$0xff]  ;;  %v170_v11 = vld [vmem:[#allocation5 + $0x370] sm:$0xff]  ;;  %v153_v12 = vld [vmem:[#allocation5 + $0x2e8] sm:$0xff] }
  0x34   :  { %970 = vmatpush3.msra.mxu1 %v96_v47  ;;  %936 = vmatprep.subr.mxu0 %v79_v48  ;;  %v185_v13 = vld [vmem:[#allocation5 + $0x3e8] sm:$0xff]  ;;  %v152_v16 = vld [vmem:[#allocation5 + $0x2e0] sm:$0xff]  ;;  %v151_v20 = vld [vmem:[#allocation5 + $0x2d8] sm:$0xff] }
  0x35   :  { %971 = vmatprep.subr.mxu1 %v111_v49  ;;  %937 = vmatpush3.msra.mxu0 %v63_v50  ;;  %v137_v14 = vld [vmem:[#allocation5 + $0x268] sm:$0xff]  ;;  %v184_v17 = vld [vmem:[#allocation5 + $0x3e0] sm:$0xff]  ;;  %v183_v21 = vld [vmem:[#allocation5 + $0x3d8] sm:$0xff] }
  0x36   :  { %972 = vmatpush3.msra.mxu1 %v95_v51  ;;  %938 = vmatprep.subr.mxu0 %v78_v52  ;;  %v169_v15 = vld [vmem:[#allocation5 + $0x368] sm:$0xff]  ;;  %v136_v18 = vld [vmem:[#allocation5 + $0x260] sm:$0xff]  ;;  %v135_v22 = vld [vmem:[#allocation5 + $0x258] sm:$0xff] }
  0x37   :  { %973 = vmatprep.subr.mxu1 %v110_v53  ;;  %939 = vmatpush3.msra.mxu0 %v62_v54  ;;  %v168_v19 = vld [vmem:[#allocation5 + $0x360] sm:$0xff]  ;;  %v167_v23 = vld [vmem:[#allocation5 + $0x358] sm:$0xff]  ;;  %v150_v24 = vld [vmem:[#allocation5 + $0x2d0] sm:$0xff] }
  0x38   :  { %974 = vmatpush3.msra.mxu1 %v94_v55  ;;  %940 = vmatprep.subr.mxu0 %v77_v56  ;;  %v182_v25 = vld [vmem:[#allocation5 + $0x3d0] sm:$0xff]  ;;  %v149_v28 = vld [vmem:[#allocation5 + $0x2c8] sm:$0xff]  ;;  %v148_v32 = vld [vmem:[#allocation5 + $0x2c0] sm:$0xff] }
  0x39   :  { %975 = vmatprep.subr.mxu1 %v109_v57  ;;  %941 = vmatpush3.msra.mxu0 %v61_v58  ;;  %v134_v26 = vld [vmem:[#allocation5 + $0x250] sm:$0xff]  ;;  %v181_v29 = vld [vmem:[#allocation5 + $0x3c8] sm:$0xff]  ;;  %v180_v33 = vld [vmem:[#allocation5 + $0x3c0] sm:$0xff] }
  0x3a   :  { %976 = vmatpush3.msra.mxu1 %v93_v59  ;;  %942 = vmatprep.subr.mxu0 %v76_v60  ;;  %v166_v27 = vld [vmem:[#allocation5 + $0x350] sm:$0xff]  ;;  %v133_v30 = vld [vmem:[#allocation5 + $0x248] sm:$0xff]  ;;  %v132_v34 = vld [vmem:[#allocation5 + $0x240] sm:$0xff] }
  0x3b   :  { %977 = vmatprep.subr.mxu1 %v108_v61  ;;  %943 = vmatpush3.msra.mxu0 %v60_v62  ;;  %v165_v31 = vld [vmem:[#allocation5 + $0x348] sm:$0xff]  ;;  %v164_v35 = vld [vmem:[#allocation5 + $0x340] sm:$0xff]  ;;  %v147_v36 = vld [vmem:[#allocation5 + $0x2b8] sm:$0xff] }
  0x3c   :  { %380 = vmatprep.mubr.f32.mxu0 %v45_v63  ;;  %978 = vmatpush3.msra.mxu1 %v92_v0  ;;  %v179_v37 = vld [vmem:[#allocation5 + $0x3b8] sm:$0xff]  ;;  %v146_v40 = vld [vmem:[#allocation5 + $0x2b0] sm:$0xff]  ;;  %v145_v44 = vld [vmem:[#allocation5 + $0x2a8] sm:$0xff] }
  0x3d   :  { %450 = vmatprep.mubr.f32.mxu1 %v47_v1  ;;  %381 = vmatmul.mubr.f32.vlgmr.msra.gmra.mxu0 %v44_v2  ;;  %v131_v38 = vld [vmem:[#allocation5 + $0x238] sm:$0xff]  ;;  %v178_v41 = vld [vmem:[#allocation5 + $0x3b0] sm:$0xff]  ;;  %v177_v45 = vld [vmem:[#allocation5 + $0x3a8] sm:$0xff] }
  0x3e   :  { %451 = vmatmul.mubr.f32.vlgmr.msra.gmra.mxu1 %v46_v3  ;;  %982 = vmatprep.subr.mxu0 %v155_v4  ;;  %v163_v39 = vld [vmem:[#allocation5 + $0x338] sm:$0xff]  ;;  %v130_v42 = vld [vmem:[#allocation5 + $0x230] sm:$0xff]  ;;  %v129_v46 = vld [vmem:[#allocation5 + $0x228] sm:$0xff] }
  0x3f   :  { %1017 = vmatprep.subr.mxu1 %v187_v5  ;;  %983 = vmatpush3.msra.mxu0 %v139_v6  ;;  %v162_v43 = vld [vmem:[#allocation5 + $0x330] sm:$0xff]  ;;  %v161_v47 = vld [vmem:[#allocation5 + $0x328] sm:$0xff]  ;;  %v144_v48 = vld [vmem:[#allocation5 + $0x2a0] sm:$0xff] }
  0x40   :  { %1018 = vmatpush3.msra.mxu1 %v171_v7  ;;  %984 = vmatprep.subr.mxu0 %v154_v8  ;;  %v176_v49 = vld [vmem:[#allocation5 + $0x3a0] sm:$0xff]  ;;  %v143_v52 = vld [vmem:[#allocation5 + $0x298] sm:$0xff]  ;;  %v142_v56 = vld [vmem:[#allocation5 + $0x290] sm:$0xff] }
  0x41   :  { %1019 = vmatprep.subr.mxu1 %v186_v9  ;;  %985 = vmatpush3.msra.mxu0 %v138_v10  ;;  %v128_v50 = vld [vmem:[#allocation5 + $0x220] sm:$0xff]  ;;  %v175_v53 = vld [vmem:[#allocation5 + $0x398] sm:$0xff]  ;;  %v174_v57 = vld [vmem:[#allocation5 + $0x390] sm:$0xff] }
  0x42   :  { %1020 = vmatpush3.msra.mxu1 %v170_v11  ;;  %986 = vmatprep.subr.mxu0 %v153_v12  ;;  %v160_v51 = vld [vmem:[#allocation5 + $0x320] sm:$0xff]  ;;  %v127_v54 = vld [vmem:[#allocation5 + $0x218] sm:$0xff]  ;;  %v126_v58 = vld [vmem:[#allocation5 + $0x210] sm:$0xff] }
  0x43   :  { %1021 = vmatprep.subr.mxu1 %v185_v13  ;;  %987 = vmatpush3.msra.mxu0 %v137_v14  ;;  %v159_v55 = vld [vmem:[#allocation5 + $0x318] sm:$0xff]  ;;  %v158_v59 = vld [vmem:[#allocation5 + $0x310] sm:$0xff]  ;;  %v141_v60 = vld [vmem:[#allocation5 + $0x288] sm:$0xff] }
  0x44   :  { %1022 = vmatpush3.msra.mxu1 %v169_v15  ;;  %988 = vmatprep.subr.mxu0 %v152_v16  ;;  %v173_v61 = vld [vmem:[#allocation5 + $0x388] sm:$0xff]  ;;  %v140_v0 = vld [vmem:[#allocation5 + $0x280] sm:$0xff]  ;;  %v51_v6 = vld [vmem:[#allocation2 + $0x38] sm:$0xff] }
  0x45   :  { %1023 = vmatprep.subr.mxu1 %v184_v17  ;;  %989 = vmatpush3.msra.mxu0 %v136_v18  ;;  %v125_v62 = vld [vmem:[#allocation5 + $0x208] sm:$0xff]  ;;  %v172_v1 = vld [vmem:[#allocation5 + $0x380] sm:$0xff]  ;;  %v219_v7 = vld [vmem:[#allocation5 + $0x4f8] sm:$0xff] }
  0x46   :  { %1024 = vmatpush3.msra.mxu1 %v168_v19  ;;  %990 = vmatprep.subr.mxu0 %v151_v20  ;;  %v157_v63 = vld [vmem:[#allocation5 + $0x308] sm:$0xff]  ;;  %v124_v2 = vld [vmem:[#allocation5 + $0x200] sm:$0xff]  ;;  %v251_v8 = vld [vmem:[#allocation5 + $0x5f8] sm:$0xff] }
  0x47   :  { %1025 = vmatprep.subr.mxu1 %v183_v21  ;;  %991 = vmatpush3.msra.mxu0 %v135_v22  ;;  %v49_v3 = vld [vmem:[#allocation2 + $0x28] sm:$0xff]  ;;  %v156_v4 = vld [vmem:[#allocation5 + $0x300] sm:$0xff]  ;;  %v50_v9 = vld [vmem:[#allocation2 + $0x30] sm:$0xff] }
  0x48   :  { %1026 = vmatpush3.msra.mxu1 %v167_v23  ;;  %992 = vmatprep.subr.mxu0 %v150_v24  ;;  %v48_v5 = vld [vmem:[#allocation2 + $0x20] sm:$0xff]  ;;  %v203_v10 = vld [vmem:[#allocation5 + $0x478] sm:$0xff]  ;;  %v218_v12 = vld [vmem:[#allocation5 + $0x4f0] sm:$0xff] }
  0x49   :  { %1027 = vmatprep.subr.mxu1 %v182_v25  ;;  %993 = vmatpush3.msra.mxu0 %v134_v26  ;;  %v235_v11 = vld [vmem:[#allocation5 + $0x578] sm:$0xff]  ;;  %v250_v13 = vld [vmem:[#allocation5 + $0x5f0] sm:$0xff]  ;;  %v217_v16 = vld [vmem:[#allocation5 + $0x4e8] sm:$0xff] }
  0x4a   :  { %1028 = vmatpush3.msra.mxu1 %v166_v27  ;;  %994 = vmatprep.subr.mxu0 %v149_v28  ;;  %v202_v14 = vld [vmem:[#allocation5 + $0x470] sm:$0xff]  ;;  %v249_v17 = vld [vmem:[#allocation5 + $0x5e8] sm:$0xff]  ;;  %v216_v20 = vld [vmem:[#allocation5 + $0x4e0] sm:$0xff] }
  0x4b   :  { %1029 = vmatprep.subr.mxu1 %v181_v29  ;;  %995 = vmatpush3.msra.mxu0 %v133_v30  ;;  %v234_v15 = vld [vmem:[#allocation5 + $0x570] sm:$0xff]  ;;  %v201_v18 = vld [vmem:[#allocation5 + $0x468] sm:$0xff]  ;;  %v248_v21 = vld [vmem:[#allocation5 + $0x5e0] sm:$0xff] }
  0x4c   :  { %1030 = vmatpush3.msra.mxu1 %v165_v31  ;;  %996 = vmatprep.subr.mxu0 %v148_v32  ;;  %v233_v19 = vld [vmem:[#allocation5 + $0x568] sm:$0xff]  ;;  %v200_v22 = vld [vmem:[#allocation5 + $0x460] sm:$0xff]  ;;  %v215_v24 = vld [vmem:[#allocation5 + $0x4d8] sm:$0xff] }
  0x4d   :  { %1031 = vmatprep.subr.mxu1 %v180_v33  ;;  %997 = vmatpush3.msra.mxu0 %v132_v34  ;;  %v232_v23 = vld [vmem:[#allocation5 + $0x560] sm:$0xff]  ;;  %v247_v25 = vld [vmem:[#allocation5 + $0x5d8] sm:$0xff]  ;;  %v214_v28 = vld [vmem:[#allocation5 + $0x4d0] sm:$0xff] }
  0x4e   :  { %1032 = vmatpush3.msra.mxu1 %v164_v35  ;;  %998 = vmatprep.subr.mxu0 %v147_v36  ;;  %v199_v26 = vld [vmem:[#allocation5 + $0x458] sm:$0xff]  ;;  %v246_v29 = vld [vmem:[#allocation5 + $0x5d0] sm:$0xff]  ;;  %v213_v32 = vld [vmem:[#allocation5 + $0x4c8] sm:$0xff] }
  0x4f   :  { %1033 = vmatprep.subr.mxu1 %v179_v37  ;;  %999 = vmatpush3.msra.mxu0 %v131_v38  ;;  %v231_v27 = vld [vmem:[#allocation5 + $0x558] sm:$0xff]  ;;  %v198_v30 = vld [vmem:[#allocation5 + $0x450] sm:$0xff]  ;;  %v245_v33 = vld [vmem:[#allocation5 + $0x5c8] sm:$0xff] }
  0x50   :  { %1034 = vmatpush3.msra.mxu1 %v163_v39  ;;  %1000 = vmatprep.subr.mxu0 %v146_v40  ;;  %v230_v31 = vld [vmem:[#allocation5 + $0x550] sm:$0xff]  ;;  %v197_v34 = vld [vmem:[#allocation5 + $0x448] sm:$0xff]  ;;  %v212_v36 = vld [vmem:[#allocation5 + $0x4c0] sm:$0xff] }
  0x51   :  { %1035 = vmatprep.subr.mxu1 %v178_v41  ;;  %1001 = vmatpush3.msra.mxu0 %v130_v42  ;;  %v229_v35 = vld [vmem:[#allocation5 + $0x548] sm:$0xff]  ;;  %v244_v37 = vld [vmem:[#allocation5 + $0x5c0] sm:$0xff]  ;;  %v211_v40 = vld [vmem:[#allocation5 + $0x4b8] sm:$0xff] }
  0x52   :  { %1036 = vmatpush3.msra.mxu1 %v162_v43  ;;  %1002 = vmatprep.subr.mxu0 %v145_v44  ;;  %v196_v38 = vld [vmem:[#allocation5 + $0x440] sm:$0xff]  ;;  %v243_v41 = vld [vmem:[#allocation5 + $0x5b8] sm:$0xff]  ;;  %v210_v44 = vld [vmem:[#allocation5 + $0x4b0] sm:$0xff] }
  0x53   :  { %1037 = vmatprep.subr.mxu1 %v177_v45  ;;  %1003 = vmatpush3.msra.mxu0 %v129_v46  ;;  %v228_v39 = vld [vmem:[#allocation5 + $0x540] sm:$0xff]  ;;  %v195_v42 = vld [vmem:[#allocation5 + $0x438] sm:$0xff]  ;;  %v242_v45 = vld [vmem:[#allocation5 + $0x5b0] sm:$0xff] }
  0x54   :  { %1038 = vmatpush3.msra.mxu1 %v161_v47  ;;  %1004 = vmatprep.subr.mxu0 %v144_v48  ;;  %v227_v43 = vld [vmem:[#allocation5 + $0x538] sm:$0xff]  ;;  %v194_v46 = vld [vmem:[#allocation5 + $0x430] sm:$0xff]  ;;  %v209_v48 = vld [vmem:[#allocation5 + $0x4a8] sm:$0xff] }
  0x55   :  { %1039 = vmatprep.subr.mxu1 %v176_v49  ;;  %1005 = vmatpush3.msra.mxu0 %v128_v50  ;;  %v226_v47 = vld [vmem:[#allocation5 + $0x530] sm:$0xff]  ;;  %v241_v49 = vld [vmem:[#allocation5 + $0x5a8] sm:$0xff] }
  0x56   :  { %1040 = vmatpush3.msra.mxu1 %v160_v51  ;;  %1006 = vmatprep.subr.mxu0 %v143_v52  ;;  %v193_v50 = vld [vmem:[#allocation5 + $0x428] sm:$0xff]  ;;  %v208_v52 = vld [vmem:[#allocation5 + $0x4a0] sm:$0xff] }
  0x57   :  { %1041 = vmatprep.subr.mxu1 %v175_v53  ;;  %1007 = vmatpush3.msra.mxu0 %v127_v54  ;;  %v225_v51 = vld [vmem:[#allocation5 + $0x528] sm:$0xff]  ;;  %v240_v53 = vld [vmem:[#allocation5 + $0x5a0] sm:$0xff] }
  0x58   :  { %1042 = vmatpush3.msra.mxu1 %v159_v55  ;;  %1008 = vmatprep.subr.mxu0 %v142_v56  ;;  %v192_v54 = vld [vmem:[#allocation5 + $0x420] sm:$0xff]  ;;  %v207_v56 = vld [vmem:[#allocation5 + $0x498] sm:$0xff] }
  0x59   :  { %1043 = vmatprep.subr.mxu1 %v174_v57  ;;  %1009 = vmatpush3.msra.mxu0 %v126_v58  ;;  %v224_v55 = vld [vmem:[#allocation5 + $0x520] sm:$0xff]  ;;  %v239_v57 = vld [vmem:[#allocation5 + $0x598] sm:$0xff] }
  0x5a   :  { %1044 = vmatpush3.msra.mxu1 %v158_v59  ;;  %1010 = vmatprep.subr.mxu0 %v141_v60  ;;  %v191_v58 = vld [vmem:[#allocation5 + $0x418] sm:$0xff]  ;;  %v206_v60 = vld [vmem:[#allocation5 + $0x490] sm:$0xff] }
  0x5b   :  { %1045 = vmatprep.subr.mxu1 %v173_v61  ;;  %1011 = vmatpush3.msra.mxu0 %v125_v62  ;;  %v223_v59 = vld [vmem:[#allocation5 + $0x518] sm:$0xff]  ;;  %v238_v61 = vld [vmem:[#allocation5 + $0x590] sm:$0xff] }
  0x5c   :  { %1046 = vmatpush3.msra.mxu1 %v157_v63  ;;  %1012 = vmatprep.subr.mxu0 %v140_v0  ;;  %v190_v62 = vld [vmem:[#allocation5 + $0x410] sm:$0xff]  ;;  %v205_v0 = vld [vmem:[#allocation5 + $0x488] sm:$0xff] }
  0x5d   :  { %1047 = vmatprep.subr.mxu1 %v172_v1  ;;  %1013 = vmatpush3.msra.mxu0 %v124_v2  ;;  %v222_v63 = vld [vmem:[#allocation5 + $0x510] sm:$0xff]  ;;  %v237_v1 = vld [vmem:[#allocation5 + $0x588] sm:$0xff] }
  0x5e   :  { %520 = vmatprep.mubr.f32.mxu0 %v49_v3  ;;  %1048 = vmatpush3.msra.mxu1 %v156_v4  ;;  %v189_v2 = vld [vmem:[#allocation5 + $0x408] sm:$0xff]  ;;  %v204_v4 = vld [vmem:[#allocation5 + $0x480] sm:$0xff] }
  0x5f   :  { %521 = vmatmul.mubr.f32.vlgmr.msra.gmra.mxu0 %v48_v5  ;;  %590 = vmatprep.mubr.f32.mxu1 %v51_v6  ;;  %v221_v3 = vld [vmem:[#allocation5 + $0x508] sm:$0xff]  ;;  %v236_v5 = vld [vmem:[#allocation5 + $0x580] sm:$0xff] }
  0x60   :  { %1052 = vmatprep.subr.mxu0 %v219_v7  ;;  %1087 = vmatprep.subr.mxu1 %v251_v8  ;;  %v188_v6 = vld [vmem:[#allocation5 + $0x400] sm:$0xff]  ;;  %v53_v7 = vld [vmem:[#allocation2 + $0x48] sm:$0xff] }
  0x61   :  { %591 = vmatmul.mubr.f32.vlgmr.msra.gmra.mxu1 %v50_v9  ;;  %1053 = vmatpush3.msra.mxu0 %v203_v10  ;;  %v220_v8 = vld [vmem:[#allocation5 + $0x500] sm:$0xff]  ;;  %v55_v10 = vld [vmem:[#allocation2 + $0x58] sm:$0xff] }
  0x62   :  { %1088 = vmatpush3.msra.mxu1 %v235_v11  ;;  %1054 = vmatprep.subr.mxu0 %v218_v12  ;;  %v52_v9 = vld [vmem:[#allocation2 + $0x40] sm:$0xff]  ;;  %v283_v11 = vld [vmem:[#allocation5 + $0x6f8] sm:$0xff] }
  0x63   :  { %1089 = vmatprep.subr.mxu1 %v250_v13  ;;  %1055 = vmatpush3.msra.mxu0 %v202_v14  ;;  %v315_v12 = vld [vmem:[#allocation5 + $0x7f8] sm:$0xff]  ;;  %v54_v13 = vld [vmem:[#allocation2 + $0x50] sm:$0xff] }
  0x64   :  { %1090 = vmatpush3.msra.mxu1 %v234_v15  ;;  %1056 = vmatprep.subr.mxu0 %v217_v16  ;;  %v267_v14 = vld [vmem:[#allocation5 + $0x678] sm:$0xff]  ;;  %v282_v16 = vld [vmem:[#allocation5 + $0x6f0] sm:$0xff] }
  0x65   :  { %1091 = vmatprep.subr.mxu1 %v249_v17  ;;  %1057 = vmatpush3.msra.mxu0 %v201_v18  ;;  %v299_v15 = vld [vmem:[#allocation5 + $0x778] sm:$0xff]  ;;  %v314_v17 = vld [vmem:[#allocation5 + $0x7f0] sm:$0xff] }
  0x66   :  { %1092 = vmatpush3.msra.mxu1 %v233_v19  ;;  %1058 = vmatprep.subr.mxu0 %v216_v20  ;;  %v266_v18 = vld [vmem:[#allocation5 + $0x670] sm:$0xff]  ;;  %v281_v20 = vld [vmem:[#allocation5 + $0x6e8] sm:$0xff] }
  0x67   :  { %1093 = vmatprep.subr.mxu1 %v248_v21  ;;  %1059 = vmatpush3.msra.mxu0 %v200_v22  ;;  %v298_v19 = vld [vmem:[#allocation5 + $0x770] sm:$0xff]  ;;  %v313_v21 = vld [vmem:[#allocation5 + $0x7e8] sm:$0xff] }
  0x68   :  { %1094 = vmatpush3.msra.mxu1 %v232_v23  ;;  %1060 = vmatprep.subr.mxu0 %v215_v24  ;;  %v265_v22 = vld [vmem:[#allocation5 + $0x668] sm:$0xff]  ;;  %v280_v24 = vld [vmem:[#allocation5 + $0x6e0] sm:$0xff] }
  0x69   :  { %1095 = vmatprep.subr.mxu1 %v247_v25  ;;  %1061 = vmatpush3.msra.mxu0 %v199_v26  ;;  %v297_v23 = vld [vmem:[#allocation5 + $0x768] sm:$0xff]  ;;  %v312_v25 = vld [vmem:[#allocation5 + $0x7e0] sm:$0xff] }
  0x6a   :  { %1096 = vmatpush3.msra.mxu1 %v231_v27  ;;  %1062 = vmatprep.subr.mxu0 %v214_v28  ;;  %v264_v26 = vld [vmem:[#allocation5 + $0x660] sm:$0xff]  ;;  %v279_v28 = vld [vmem:[#allocation5 + $0x6d8] sm:$0xff] }
  0x6b   :  { %1097 = vmatprep.subr.mxu1 %v246_v29  ;;  %1063 = vmatpush3.msra.mxu0 %v198_v30  ;;  %v296_v27 = vld [vmem:[#allocation5 + $0x760] sm:$0xff]  ;;  %v311_v29 = vld [vmem:[#allocation5 + $0x7d8] sm:$0xff] }
  0x6c   :  { %1098 = vmatpush3.msra.mxu1 %v230_v31  ;;  %1064 = vmatprep.subr.mxu0 %v213_v32  ;;  %v263_v30 = vld [vmem:[#allocation5 + $0x658] sm:$0xff]  ;;  %v278_v32 = vld [vmem:[#allocation5 + $0x6d0] sm:$0xff] }
  0x6d   :  { %1099 = vmatprep.subr.mxu1 %v245_v33  ;;  %1065 = vmatpush3.msra.mxu0 %v197_v34  ;;  %v295_v31 = vld [vmem:[#allocation5 + $0x758] sm:$0xff]  ;;  %v310_v33 = vld [vmem:[#allocation5 + $0x7d0] sm:$0xff] }
  0x6e   :  { %1100 = vmatpush3.msra.mxu1 %v229_v35  ;;  %1066 = vmatprep.subr.mxu0 %v212_v36  ;;  %v262_v34 = vld [vmem:[#allocation5 + $0x650] sm:$0xff]  ;;  %v277_v36 = vld [vmem:[#allocation5 + $0x6c8] sm:$0xff] }
  0x6f   :  { %1101 = vmatprep.subr.mxu1 %v244_v37  ;;  %1067 = vmatpush3.msra.mxu0 %v196_v38  ;;  %v294_v35 = vld [vmem:[#allocation5 + $0x750] sm:$0xff]  ;;  %v309_v37 = vld [vmem:[#allocation5 + $0x7c8] sm:$0xff] }
  0x70   :  { %1102 = vmatpush3.msra.mxu1 %v228_v39  ;;  %1068 = vmatprep.subr.mxu0 %v211_v40  ;;  %v261_v38 = vld [vmem:[#allocation5 + $0x648] sm:$0xff]  ;;  %v276_v40 = vld [vmem:[#allocation5 + $0x6c0] sm:$0xff] }
  0x71   :  { %1103 = vmatprep.subr.mxu1 %v243_v41  ;;  %1069 = vmatpush3.msra.mxu0 %v195_v42  ;;  %v293_v39 = vld [vmem:[#allocation5 + $0x748] sm:$0xff]  ;;  %v308_v41 = vld [vmem:[#allocation5 + $0x7c0] sm:$0xff] }
  0x72   :  { %1104 = vmatpush3.msra.mxu1 %v227_v43  ;;  %1070 = vmatprep.subr.mxu0 %v210_v44  ;;  %v260_v42 = vld [vmem:[#allocation5 + $0x640] sm:$0xff]  ;;  %v275_v44 = vld [vmem:[#allocation5 + $0x6b8] sm:$0xff] }
  0x73   :  { %1105 = vmatprep.subr.mxu1 %v242_v45  ;;  %1071 = vmatpush3.msra.mxu0 %v194_v46  ;;  %v292_v43 = vld [vmem:[#allocation5 + $0x740] sm:$0xff]  ;;  %v307_v45 = vld [vmem:[#allocation5 + $0x7b8] sm:$0xff] }
  0x74   :  { %1106 = vmatpush3.msra.mxu1 %v226_v47  ;;  %1072 = vmatprep.subr.mxu0 %v209_v48  ;;  %v259_v46 = vld [vmem:[#allocation5 + $0x638] sm:$0xff]  ;;  %v274_v48 = vld [vmem:[#allocation5 + $0x6b0] sm:$0xff] }
  0x75   :  { %1107 = vmatprep.subr.mxu1 %v241_v49  ;;  %1073 = vmatpush3.msra.mxu0 %v193_v50  ;;  %v291_v47 = vld [vmem:[#allocation5 + $0x738] sm:$0xff]  ;;  %v306_v49 = vld [vmem:[#allocation5 + $0x7b0] sm:$0xff] }
  0x76   :  { %1108 = vmatpush3.msra.mxu1 %v225_v51  ;;  %1074 = vmatprep.subr.mxu0 %v208_v52  ;;  %v258_v50 = vld [vmem:[#allocation5 + $0x630] sm:$0xff]  ;;  %v273_v52 = vld [vmem:[#allocation5 + $0x6a8] sm:$0xff] }
  0x77   :  { %1109 = vmatprep.subr.mxu1 %v240_v53  ;;  %1075 = vmatpush3.msra.mxu0 %v192_v54  ;;  %v290_v51 = vld [vmem:[#allocation5 + $0x730] sm:$0xff]  ;;  %v305_v53 = vld [vmem:[#allocation5 + $0x7a8] sm:$0xff] }
  0x78   :  { %1110 = vmatpush3.msra.mxu1 %v224_v55  ;;  %1076 = vmatprep.subr.mxu0 %v207_v56  ;;  %v257_v54 = vld [vmem:[#allocation5 + $0x628] sm:$0xff]  ;;  %v272_v56 = vld [vmem:[#allocation5 + $0x6a0] sm:$0xff] }
  0x79   :  { %1111 = vmatprep.subr.mxu1 %v239_v57  ;;  %1077 = vmatpush3.msra.mxu0 %v191_v58  ;;  %v289_v55 = vld [vmem:[#allocation5 + $0x728] sm:$0xff]  ;;  %v304_v57 = vld [vmem:[#allocation5 + $0x7a0] sm:$0xff] }
  0x7a   :  { %1112 = vmatpush3.msra.mxu1 %v223_v59  ;;  %1078 = vmatprep.subr.mxu0 %v206_v60  ;;  %v256_v58 = vld [vmem:[#allocation5 + $0x620] sm:$0xff]  ;;  %v271_v60 = vld [vmem:[#allocation5 + $0x698] sm:$0xff] }
  0x7b   :  { %1113 = vmatprep.subr.mxu1 %v238_v61  ;;  %1079 = vmatpush3.msra.mxu0 %v190_v62  ;;  %v288_v59 = vld [vmem:[#allocation5 + $0x720] sm:$0xff]  ;;  %v303_v61 = vld [vmem:[#allocation5 + $0x798] sm:$0xff] }
  0x7c   :  { %1114 = vmatpush3.msra.mxu1 %v222_v63  ;;  %1080 = vmatprep.subr.mxu0 %v205_v0  ;;  %v255_v62 = vld [vmem:[#allocation5 + $0x618] sm:$0xff]  ;;  %v270_v0 = vld [vmem:[#allocation5 + $0x690] sm:$0xff] }
  0x7d   :  { %1115 = vmatprep.subr.mxu1 %v237_v1  ;;  %1081 = vmatpush3.msra.mxu0 %v189_v2  ;;  %v287_v63 = vld [vmem:[#allocation5 + $0x718] sm:$0xff]  ;;  %v302_v1 = vld [vmem:[#allocation5 + $0x790] sm:$0xff] }
  0x7e   :  { %1116 = vmatpush3.msra.mxu1 %v221_v3  ;;  %1082 = vmatprep.subr.mxu0 %v204_v4  ;;  %v254_v2 = vld [vmem:[#allocation5 + $0x610] sm:$0xff]  ;;  %v269_v4 = vld [vmem:[#allocation5 + $0x688] sm:$0xff] }
  0x7f   :  { %1117 = vmatprep.subr.mxu1 %v236_v5  ;;  %1083 = vmatpush3.msra.mxu0 %v188_v6  ;;  %v286_v3 = vld [vmem:[#allocation5 + $0x710] sm:$0xff]  ;;  %v301_v5 = vld [vmem:[#allocation5 + $0x788] sm:$0xff] }
  0x80   :  { %660 = vmatprep.mubr.f32.mxu0 %v53_v7  ;;  %1118 = vmatpush3.msra.mxu1 %v220_v8  ;;  %v253_v6 = vld [vmem:[#allocation5 + $0x608] sm:$0xff]  ;;  %v268_v8 = vld [vmem:[#allocation5 + $0x680] sm:$0xff] }
  0x81   :  { %661 = vmatmul.mubr.f32.vlgmr.msra.gmra.mxu0 %v52_v9  ;;  %730 = vmatprep.mubr.f32.mxu1 %v55_v10  ;;  %v285_v7 = vld [vmem:[#allocation5 + $0x708] sm:$0xff]  ;;  %v300_v9 = vld [vmem:[#allocation5 + $0x780] sm:$0xff] }
  0x82   :  { %1122 = vmatprep.subr.mxu0 %v283_v11  ;;  %1157 = vmatprep.subr.mxu1 %v315_v12  ;;  %v252_v10 = vld [vmem:[#allocation5 + $0x600] sm:$0xff]  ;;  %v57_v11 = vld [vmem:[#allocation2 + $0x68] sm:$0xff] }
  0x83   :  { %731 = vmatmul.mubr.f32.vlgmr.msra.gmra.mxu1 %v54_v13  ;;  %1123 = vmatpush3.msra.mxu0 %v267_v14  ;;  %v284_v12 = vld [vmem:[#allocation5 + $0x700] sm:$0xff]  ;;  %v59_v13 = vld [vmem:[#allocation2 + $0x78] sm:$0xff] }
  0x84   :  { %1158 = vmatpush3.msra.mxu1 %v299_v15  ;;  %1124 = vmatprep.subr.mxu0 %v282_v16  ;;  %v56_v14 = vld [vmem:[#allocation2 + $0x60] sm:$0xff]  ;;  %v58_v15 = vld [vmem:[#allocation2 + $0x70] sm:$0xff] }
  0x85   :  { %1159 = vmatprep.subr.mxu1 %v314_v17  ;;  %1125 = vmatpush3.msra.mxu0 %v266_v18  ;;  %v876_v16 = vld [vmem:[%s1313_s2] sm:$0xff]  ;;  %v1269_v17 = vmov 0  }
  0x86   :  { %1160 = vmatpush3.msra.mxu1 %v298_v19  ;;  %1126 = vmatprep.subr.mxu0 %v281_v20 }
  0x87   :  { %1161 = vmatprep.subr.mxu1 %v313_v21  ;;  %1127 = vmatpush3.msra.mxu0 %v265_v22 }
  0x88   :  { %1162 = vmatpush3.msra.mxu1 %v297_v23  ;;  %1128 = vmatprep.subr.mxu0 %v280_v24 }
  0x89   :  { %1163 = vmatprep.subr.mxu1 %v312_v25  ;;  %1129 = vmatpush3.msra.mxu0 %v264_v26 }
  0x8a   :  { %1164 = vmatpush3.msra.mxu1 %v296_v27  ;;  %1130 = vmatprep.subr.mxu0 %v279_v28 }
  0x8b   :  { %1165 = vmatprep.subr.mxu1 %v311_v29  ;;  %1131 = vmatpush3.msra.mxu0 %v263_v30 }
  0x8c   :  { %1166 = vmatpush3.msra.mxu1 %v295_v31  ;;  %1132 = vmatprep.subr.mxu0 %v278_v32 }
  0x8d   :  { %1167 = vmatprep.subr.mxu1 %v310_v33  ;;  %1133 = vmatpush3.msra.mxu0 %v262_v34 }
  0x8e   :  { %1168 = vmatpush3.msra.mxu1 %v294_v35  ;;  %1134 = vmatprep.subr.mxu0 %v277_v36 }
  0x8f   :  { %1169 = vmatprep.subr.mxu1 %v309_v37  ;;  %1135 = vmatpush3.msra.mxu0 %v261_v38 }
  0x90   :  { %1170 = vmatpush3.msra.mxu1 %v293_v39  ;;  %1136 = vmatprep.subr.mxu0 %v276_v40 }
  0x91   :  { %1171 = vmatprep.subr.mxu1 %v308_v41  ;;  %1137 = vmatpush3.msra.mxu0 %v260_v42 }
  0x92   :  { %1172 = vmatpush3.msra.mxu1 %v292_v43  ;;  %1138 = vmatprep.subr.mxu0 %v275_v44 }
  0x93   :  { %1173 = vmatprep.subr.mxu1 %v307_v45  ;;  %1139 = vmatpush3.msra.mxu0 %v259_v46 }
  0x94   :  { %1174 = vmatpush3.msra.mxu1 %v291_v47  ;;  %1140 = vmatprep.subr.mxu0 %v274_v48 }
  0x95   :  { %1175 = vmatprep.subr.mxu1 %v306_v49  ;;  %1141 = vmatpush3.msra.mxu0 %v258_v50  ;;  %v910_v50 = vld [vmem:[%s1314_s3] ss:$0 sm:$0xff] }
  0x96   :  { %1176 = vmatpush3.msra.mxu1 %v290_v51  ;;  %1142 = vmatprep.subr.mxu0 %v273_v52 }
  0x97   :  { %1177 = vmatprep.subr.mxu1 %v305_v53  ;;  %1143 = vmatpush3.msra.mxu0 %v257_v54 }
  0x98   :  { %1178 = vmatpush3.msra.mxu1 %v289_v55  ;;  %1144 = vmatprep.subr.mxu0 %v272_v56 }
  0x99   :  { %1179 = vmatprep.subr.mxu1 %v304_v57  ;;  %1145 = vmatpush3.msra.mxu0 %v256_v58 }
  0x9a   :  { %1180 = vmatpush3.msra.mxu1 %v288_v59  ;;  %1146 = vmatprep.subr.mxu0 %v271_v60 }
  0x9b   :  { %1181 = vmatprep.subr.mxu1 %v303_v61  ;;  %1147 = vmatpush3.msra.mxu0 %v255_v62 }
  0x9c   :  { %1182 = vmatpush3.msra.mxu1 %v287_v63  ;;  %1148 = vmatprep.subr.mxu0 %v270_v0 }
  0x9d   :  { %1183 = vmatprep.subr.mxu1 %v302_v1  ;;  %1149 = vmatpush3.msra.mxu0 %v254_v2 }
  0x9e   :  { %1184 = vmatpush3.msra.mxu1 %v286_v3  ;;  %1150 = vmatprep.subr.mxu0 %v269_v4 }
  0x9f   :  { %1185 = vmatprep.subr.mxu1 %v301_v5  ;;  %1151 = vmatpush3.msra.mxu0 %v253_v6 }
  0xa0   :  { %1186 = vmatpush3.msra.mxu1 %v285_v7  ;;  %1152 = vmatprep.subr.mxu0 %v268_v8 }
  0xa1   :  { %1187 = vmatprep.subr.mxu1 %v300_v9  ;;  %1153 = vmatpush3.msra.mxu0 %v252_v10 }
  0xa2   :  { %800 = vmatprep.mubr.f32.mxu0 %v57_v11  ;;  %1188 = vmatpush3.msra.mxu1 %v284_v12 }
  0xa3   :  { %870 = vmatprep.mubr.f32.mxu1 %v59_v13  ;;  %801 = vmatmul.mubr.f32.vlgmr.msra.gmra.mxu0 %v56_v14 }
  0xa4   :  { %871 = vmatmul.mubr.f32.vlgmr.msra.gmra.mxu1 %v58_v15  ;;  %1198 = vset.pattern.permute.xlu0 %v1269_v17 }
  0xa5   :  { %879 = vperm.xlu0 %1198, %v876_v16  }
  0xfd   :  { %v944_v18 = vpop.f32.mrf.mxu0 }
  0xfe   :  { %v979_v19 = vpop.f32.mrf.mxu1 }
  0xff   :  { %v945_v20 = vpop.f32.mrf.mxu0 }
 0x100   :  { %v980_v22 = vpop.f32.mrf.mxu1  ;;  %v946_v25 = vadd.f32 %v945_v20, %v944_v18 }
 0x101   :  { %v981_v26 = vadd.f32 %v980_v22, %v979_v19 }
 0x103   :  { %v453_v30 = vadd.f32 %v981_v26, %v946_v25 }
 0x11f   :  { %v1014_v21 = vpop.f32.mrf.mxu0 }
 0x120   :  { %v880_v48 = vpop.permute.xlu0 %879 }
 0x121   :  { %v1049_v23 = vpop.f32.mrf.mxu1  ;;  %v1015_v24 = vpop.f32.mrf.mxu0 }
 0x122   :  { %v1016_v28 = vadd.f32 %v1015_v24, %v1014_v21 }
 0x123   :  { %v1050_v29 = vpop.f32.mrf.mxu1 }
 0x124   :  { %v523_v33 = vadd.f32 %v1016_v28, %v453_v30  ;;  %v1051_v34 = vadd.f32 %v1050_v29, %v1049_v23 }
 0x126   :  { %v593_v37 = vadd.f32 %v1051_v34, %v523_v33 }
 0x141   :  { %v1084_v27 = vpop.f32.mrf.mxu0 }
 0x143   :  { %v1119_v31 = vpop.f32.mrf.mxu1  ;;  %v1085_v32 = vpop.f32.mrf.mxu0 }
 0x144   :  { %v1086_v35 = vadd.f32 %v1085_v32, %v1084_v27 }
 0x145   :  { %v1120_v36 = vpop.f32.mrf.mxu1 }
 0x146   :  { %v663_v38 = vadd.f32 %v1086_v35, %v593_v37  ;;  %v1121_v39 = vadd.f32 %v1120_v36, %v1119_v31 }
 0x148   :  { %v733_v44 = vadd.f32 %v1121_v39, %v663_v38 }
 0x163   :  { %v1154_v40 = vpop.f32.mrf.mxu0 }
 0x164   :  { %v1189_v41 = vpop.f32.mrf.mxu1 }
 0x165   :  { %v1155_v42 = vpop.f32.mrf.mxu0 }
 0x166   :  { %v1190_v43 = vpop.f32.mrf.mxu1  ;;  %v1156_v45 = vadd.f32 %v1155_v42, %v1154_v40 }
 0x167   :  { %v1191_v47 = vadd.f32 %v1190_v43, %v1189_v41 }
 0x168   :  { %v803_v46 = vadd.f32 %v1156_v45, %v733_v44 }
 0x16a   :  { %v873_v49 = vadd.f32 %v1191_v47, %v803_v46 }
 0x16c   :  { %v882_v51 = vmul.f32 %v880_v48, %v873_v49 }
 0x16e   :  { %v890_v52 = vmul.f32 %v910_v50, %v882_v51 }
 0x170   :  { %v911_v53 = vclamps-f32 %v890_v52, 1.0 }
 0x172   :  { %893 = vst [vmem:[#allocation7] sm:$0xff] %v911_v53 }
 0x173   :  { %1250 = shalt.err (!%p1247_p0)
}
 0x174   :  { %903 = dma.vmem_to_hbm [thread:$0]  %s901_s29, 128, %s1315_s4, [#allocation4]  }
 0x175   :  { %1263 = dma.done.wait [#allocation4], 128  }
 0x176   :  { %1264 = vsyncadd [#allocation4], 4294967168 }
 0x177   :  { %907 = vsyncpa [#allocation3], 1 }
 0x178   :  { %908 = vsyncpa [#allocation6], 1 }
 0x179   :  { %909 = vsyncpa [#allocation4], 1 }

</bundles_post_ra>
